<compile_context>
chip_gen: v7x
topology: tpu7x:2x2x1
jax: 0.10.0
libtpu: 0.0.40
codegen_flags: <defaults>
</compile_context>

<pallas_src>
import math
import functools

import jax
import jax.numpy as jnp
from jax.experimental import pallas as pl
from jax.experimental.pallas import tpu as pltpu

LN_EPS = 1e-5  # PyTorch nn.LayerNorm default


def mhsa_kernel(x_ref, ln_ref, wqkv_ref, bqkv_ref, wo_ref, bo_ref, o_ref,
                *, num_heads, kv_tile, matmul_dtype=None):
    """Fused LayerNorm + multi-head self-attention for one batch element.

    x_ref    : [1, S, E]   tokens of this batch element
    ln_ref   : [2, E]      (gamma, beta)
    wqkv_ref : [E, 3E]     stacked [Wq*scale | Wk | Wv], (in, out) layout
    bqkv_ref : [1, 3E]     stacked [bq*scale | bk | bv]
    wo_ref   : [E, E]      output projection, (in, out) layout
    bo_ref   : [1, E]      output bias
    o_ref    : [1, S, E]
    """
    x = x_ref[0]                       # [S, E]
    S, E = x.shape
    H = num_heads
    Dh = E // H

    def mm(a, b):
        # MXU matmul: optionally narrow operands to bf16 (all gens), f32 accum.
        if matmul_dtype is not None:
            a = a.astype(matmul_dtype)
            b = b.astype(matmul_dtype)
        return jnp.dot(a, b, preferred_element_type=jnp.float32)

    def bmm(eq, a, b):
        if matmul_dtype is not None:
            a = a.astype(matmul_dtype)
            b = b.astype(matmul_dtype)
        return jnp.einsum(eq, a, b, preferred_element_type=jnp.float32)

    # ---- LayerNorm (f32, biased variance == torch semantics) ----
    xf = x.astype(jnp.float32)
    mean = jnp.mean(xf, axis=-1, keepdims=True)
    var = jnp.mean(jnp.square(xf - mean), axis=-1, keepdims=True)
    xn = (xf - mean) * jax.lax.rsqrt(var + LN_EPS)
    xn = xn * ln_ref[0] + ln_ref[1]                              # [S, E]

    # ---- fused QKV projection: single lane-dense [S,E] @ [E,3E] ----
    qkv = mm(xn, wqkv_ref[...]) + bqkv_ref[...]                  # [S, 3E] f32
    q = qkv[:, 0:E]            # already scaled by 1/sqrt(Dh) (folded on host)
    k = qkv[:, E:2 * E]
    v = qkv[:, 2 * E:3 * E]

    # ---- one-time lanes -> head-major relayout (XLU/VPU; MXU idle here) ----
    def to_heads(t):                                             # [S,E]->[H,S,Dh]
        return jnp.stack([t[:, h * Dh:(h + 1) * Dh] for h in range(H)], axis=0)

    qh = to_heads(q)
    kh = to_heads(k)
    vh = to_heads(v)

    # ---- KV-tiled scaled-dot-product attention with online softmax ----
    # Statically unrolled over S // kv_tile tiles; peak score block is
    # [H, S, kv_tile] instead of [H, S, S].  One tile == plain dense softmax.
    Tk = kv_tile
    num_kv = S // Tk
    m = l = acc = None
    for t in range(num_kv):
        kt = kh[:, t * Tk:(t + 1) * Tk, :]                       # [H, Tk, Dh]
        vt = vh[:, t * Tk:(t + 1) * Tk, :]
        s = bmm("hqd,hkd->hqk", qh, kt)                          # [H, S, Tk] f32
        m_t = jnp.max(s, axis=-1, keepdims=True)
        if m is None:                                            # first tile
            m = m_t
            p = jnp.exp(s - m)
            l = jnp.sum(p, axis=-1, keepdims=True)
            acc = bmm("hqk,hkd->hqd", p, vt)                     # [H, S, Dh]
        else:
            m_new = jnp.maximum(m, m_t)
            alpha = jnp.exp(m - m_new)
            p = jnp.exp(s - m_new)
            l = alpha * l + jnp.sum(p, axis=-1, keepdims=True)
            acc = alpha * acc + bmm("hqk,hkd->hqd", p, vt)
            m = m_new

    # Exact reciprocal (approx=False): keeps the f32 path at torch parity.
    og = acc * pl.reciprocal(l, approx=False)                    # [H, S, Dh]

    # ---- heads -> lanes, single [S,E] @ [E,E] output projection ----
    cat = jnp.concatenate([og[h] for h in range(H)], axis=-1)    # [S, E]
    out = mm(cat, wo_ref[...]) + bo_ref[...]                     # [S, E]

    o_ref[0] = out.astype(o_ref.dtype)


def mhsa_block(x, params, num_heads, *, kv_tile=None, matmul_dtype=None):
    """x: [B, S, E] float32.  params: pre-transposed [E,E] weights, (1,E) biases.

    kv_tile     : KV tile length for the online-softmax attention core
                  (defaults to S for S<=512, else 512; must divide S).
    matmul_dtype: e.g. jnp.bfloat16 to run MXU matmuls in bf16 (recommended on
                  v5e AND v6e/v7x); None keeps everything f32 (torch parity).
    """
    B, S, E = x.shape
    H = num_heads
    assert E % H == 0, "embedding_dim must be divisible by num_heads"
    Dh = E // H
    assert S % 8 == 0, "S must be a multiple of 8 (f32 sublane); prefer 16 for bf16"
    if kv_tile is None:
        kv_tile = S if S <= 512 else 512
    assert S % kv_tile == 0 and (kv_tile == S or kv_tile % 8 == 0), \
        "kv_tile must divide S and be a sublane multiple"
    scale = 1.0 / math.sqrt(Dh)

    # Host-side (free) restructuring: softmax scale folded into Wq/bq, QKV
    # weights stacked into one lane-dense [E, 3E] slab, small params stacked.
    wqkv = jnp.concatenate(
        [params["wq_t"] * scale, params["wk_t"], params["wv_t"]], axis=1)   # [E,3E]
    bqkv = jnp.concatenate(
        [params["bq"] * scale, params["bk"], params["bv"]], axis=1)         # [1,3E]
    ln = jnp.concatenate([params["ln_g"], params["ln_b"]], axis=0)          # [2, E]
    wo = params["wo_t"]                                                     # [E, E]
    bo = params["bo"]                                                       # [1, E]

    # Per-grid-step VMEM estimate (f32 bytes) -> explicit scoped-vmem limit.
    est_elems = (
        4 * S * E                       # double-buffered x + out blocks
        + 3 * E * E + 3 * E             # Wqkv + bqkv
        + E * E + E + 2 * E             # Wo + bo + ln
        + S * E                         # xn
        + 3 * S * E                     # qkv
        + 3 * S * E                     # head-major q/k/v copies
        + 2 * H * S * kv_tile           # per-tile scores + probs
        + S * E + 2 * H * S             # acc + m + l
        + 2 * S * E                     # concat + projected out
    )
    est_bytes = 4 * est_elems
    assert est_bytes <= 56 * 1024 * 1024, (
        "per-step VMEM estimate too large for v7x (64 MiB); reduce kv_tile")
    vmem_limit = int(min(max(2 * est_bytes, 32 * 1024 * 1024), 64 * 1024 * 1024))

    kernel = functools.partial(mhsa_kernel, num_heads=H, kv_tile=kv_tile,
                               matmul_dtype=matmul_dtype)

    return pl.pallas_call(
        kernel,
        out_shape=jax.ShapeDtypeStruct((B, S, E), x.dtype),
        grid=(B,),                                          # >=2 steps feed both v7x TCs
        in_specs=[
            pl.BlockSpec((1, S, E), lambda b: (b, 0, 0)),   # x (pipelined over batch)
            pl.BlockSpec((2, E), lambda b: (0, 0)),         # ln gamma/beta (resident)
            pl.BlockSpec((E, 3 * E), lambda b: (0, 0)),     # Wqkv           (resident)
            pl.BlockSpec((1, 3 * E), lambda b: (0, 0)),     # bqkv           (resident)
            pl.BlockSpec((E, E), lambda b: (0, 0)),         # Wo             (resident)
            pl.BlockSpec((1, E), lambda b: (0, 0)),         # bo             (resident)
        ],
        out_specs=pl.BlockSpec((1, S, E), lambda b: (b, 0, 0)),
        compiler_params=pltpu.CompilerParams(
            dimension_semantics=("parallel",),
            vmem_limit_bytes=vmem_limit),
    )(x, ln, wqkv, bqkv, wo, bo)


def reference(x, params, num_heads):
    """Pure-JAX reference matching torch semantics (dropout=0, no mask)."""
    B, S, E = x.shape
    Dh = E // num_heads
    mean = jnp.mean(x, axis=-1, keepdims=True)
    var = jnp.mean((x - mean) ** 2, axis=-1, keepdims=True)
    xn = (x - mean) / jnp.sqrt(var + LN_EPS) * params["ln_g"][0] + params["ln_b"][0]
    q = xn @ params["wq_t"] + params["bq"][0]
    k = xn @ params["wk_t"] + params["bk"][0]
    v = xn @ params["wv_t"] + params["bv"][0]
    qh = q.reshape(B, S, num_heads, Dh).transpose(0, 2, 1, 3)
    kh = k.reshape(B, S, num_heads, Dh).transpose(0, 2, 1, 3)
    vh = v.reshape(B, S, num_heads, Dh).transpose(0, 2, 1, 3)
    s = jnp.einsum("bhqd,bhkd->bhqk", qh / math.sqrt(Dh), kh)
    p = jax.nn.softmax(s, axis=-1)
    o = jnp.einsum("bhqk,bhkd->bhqd", p, vh).transpose(0, 2, 1, 3).reshape(B, S, E)
    return o @ params["wo_t"] + params["bo"][0]


if __name__ == "__main__":
    # Small shapes consistent with the module: embedding_dim=32, num_heads=4.
    B, S, E, H = 2, 8, 32, 4

    key = jax.random.PRNGKey(0)
    ks = jax.random.split(key, 12)

    def w(k):
        return 0.02 * jax.random.normal(k, (E, E), jnp.float32)

    params = {
        "ln_g": 1.0 + 0.1 * jax.random.normal(ks[0], (1, E), jnp.float32),
        "ln_b": 0.1 * jax.random.normal(ks[1], (1, E), jnp.float32),
        "wq_t": w(ks[2]),
        "wk_t": w(ks[3]),
        "wv_t": w(ks[4]),
        "bq": 0.01 * jax.random.normal(ks[5], (1, E), jnp.float32),
        "bk": 0.01 * jax.random.normal(ks[6], (1, E), jnp.float32),
        "bv": 0.01 * jax.random.normal(ks[7], (1, E), jnp.float32),
        "wo_t": w(ks[8]),
        "bo": 0.01 * jax.random.normal(ks[9], (1, E), jnp.float32),
    }

    x = jax.random.normal(ks[10], (B, S, E), jnp.float32)
    ref = reference(x, params, num_heads=H)

    # f32 MXU path (exact torch-semantics path; exact softmax reciprocal).
    out = jax.block_until_ready(mhsa_block(x, params, num_heads=H))
    assert out.shape == (B, S, E)
    assert jnp.allclose(out, ref, rtol=1e-3, atol=2e-4), "f32 kernel mismatch"

    # bf16-MXU operands (recommended on v5e/v6e/v7x); f32 LN/softmax.
    out_bf16 = jax.block_until_ready(
        mhsa_block(x, params, num_heads=H, matmul_dtype=jnp.bfloat16))
    assert jnp.allclose(out_bf16, ref, rtol=2e-2, atol=3e-3), "bf16 kernel mismatch"

    # Longer sequence exercising the KV-tiled online-softmax path (2 tiles).
    S2 = 128
    x2 = jax.random.normal(ks[11], (B, S2, E), jnp.float32)
    ref2 = reference(x2, params, num_heads=H)
    out2 = jax.block_until_ready(
        mhsa_block(x2, params, num_heads=H, kv_tile=64))
    assert jnp.allclose(out2, ref2, rtol=2e-3, atol=1e-3), "kv-tiled kernel mismatch"

    print("KERNEL_OK")
</pallas_src>

<mosaic_0001>
module attributes {stable_mosaic.version = 11 : i64} {
  func.func @mhsa_kernel(%arg0: i32, %arg1: memref<1x8x32xf32, #tpu.memory_space<vmem>>, %arg2: memref<2x32xf32, #tpu.memory_space<vmem>>, %arg3: memref<32x96xf32, #tpu.memory_space<vmem>>, %arg4: memref<1x96xf32, #tpu.memory_space<vmem>>, %arg5: memref<32x32xf32, #tpu.memory_space<vmem>>, %arg6: memref<1x32xf32, #tpu.memory_space<vmem>>, %arg7: memref<1x8x32xf32, #tpu.memory_space<vmem>>) attributes {dimension_semantics = [#tpu.dimension_semantics<parallel>], iteration_bounds = array<i64: 2>, scalar_prefetch = 0 : i64, scratch_operands = 0 : i64, tpu.core_type = #tpu.core_type<tc>, window_params = [{transform_indices = @transform_0, window_bounds = array<i64: 1, 8, 32>}, {pipeline_mode = #tpu.pipeline_mode<synchronous>, transform_indices = @transform_1, window_bounds = array<i64: 2, 32>}, {pipeline_mode = #tpu.pipeline_mode<synchronous>, transform_indices = @transform_2, window_bounds = array<i64: 32, 96>}, {pipeline_mode = #tpu.pipeline_mode<synchronous>, transform_indices = @transform_3, window_bounds = array<i64: 1, 96>}, {pipeline_mode = #tpu.pipeline_mode<synchronous>, transform_indices = @transform_4, window_bounds = array<i64: 32, 32>}, {pipeline_mode = #tpu.pipeline_mode<synchronous>, transform_indices = @transform_5, window_bounds = array<i64: 1, 32>}, {transform_indices = @transform_6, window_bounds = array<i64: 1, 8, 32>}]} {
    %c0 = arith.constant 0 : index
    %c0_0 = arith.constant 0 : index
    %c0_1 = arith.constant 0 : index
    %0 = vector.load %arg1[%c0, %c0_0, %c0_1] : memref<1x8x32xf32, #tpu.memory_space<vmem>>, vector<1x8x32xf32>
    %1 = vector.shape_cast %0 : vector<1x8x32xf32> to vector<8x32xf32>
    %cst = arith.constant dense<0.000000e+00> : vector<8xf32>
    %2 = vector.multi_reduction <add>, %1, %cst [1] : vector<8x32xf32> to vector<8xf32>
    %3 = vector.shape_cast %2 : vector<8xf32> to vector<8x1xf32>
    %cst_2 = arith.constant 3.200000e+01 : f32
    %4 = vector.broadcast %cst_2 : f32 to vector<8x1xf32>
    %5 = arith.divf %3, %4 : vector<8x1xf32>
    %6 = vector.broadcast %5 : vector<8x1xf32> to vector<8x32xf32>
    %7 = arith.subf %1, %6 : vector<8x32xf32>
    %8 = arith.mulf %7, %7 : vector<8x32xf32>
    %cst_3 = arith.constant dense<0.000000e+00> : vector<8xf32>
    %9 = vector.multi_reduction <add>, %8, %cst_3 [1] : vector<8x32xf32> to vector<8xf32>
    %10 = vector.shape_cast %9 : vector<8xf32> to vector<8x1xf32>
    %cst_4 = arith.constant 3.200000e+01 : f32
    %11 = vector.broadcast %cst_4 : f32 to vector<8x1xf32>
    %12 = arith.divf %10, %11 : vector<8x1xf32>
    %13 = vector.broadcast %5 : vector<8x1xf32> to vector<8x32xf32>
    %14 = arith.subf %1, %13 : vector<8x32xf32>
    %cst_5 = arith.constant 9.99999974E-6 : f32
    %15 = vector.broadcast %cst_5 : f32 to vector<8x1xf32>
    %16 = arith.addf %12, %15 : vector<8x1xf32>
    %17 = math.rsqrt %16 : vector<8x1xf32>
    %18 = vector.broadcast %17 : vector<8x1xf32> to vector<8x32xf32>
    %19 = arith.mulf %14, %18 : vector<8x32xf32>
    %c0_6 = arith.constant 0 : index
    %c0_7 = arith.constant 0 : index
    %20 = vector.load %arg2[%c0_6, %c0_7] : memref<2x32xf32, #tpu.memory_space<vmem>>, vector<1x32xf32>
    %21 = vector.shape_cast %20 : vector<1x32xf32> to vector<32xf32>
    %22 = vector.shape_cast %21 : vector<32xf32> to vector<1x32xf32>
    %23 = vector.broadcast %22 : vector<1x32xf32> to vector<8x32xf32>
    %24 = arith.mulf %19, %23 : vector<8x32xf32>
    %c1 = arith.constant 1 : index
    %c0_8 = arith.constant 0 : index
    %25 = vector.load %arg2[%c1, %c0_8] : memref<2x32xf32, #tpu.memory_space<vmem>>, vector<1x32xf32>
    %26 = vector.shape_cast %25 : vector<1x32xf32> to vector<32xf32>
    %27 = vector.shape_cast %26 : vector<32xf32> to vector<1x32xf32>
    %28 = vector.broadcast %27 : vector<1x32xf32> to vector<8x32xf32>
    %29 = arith.addf %24, %28 : vector<8x32xf32>
    %c0_9 = arith.constant 0 : index
    %c0_10 = arith.constant 0 : index
    %30 = vector.load %arg3[%c0_9, %c0_10] : memref<32x96xf32, #tpu.memory_space<vmem>>, vector<32x96xf32>
    %cst_11 = arith.constant dense<0.000000e+00> : vector<8x96xf32>
    %31 = tpu.matmul %29, %30, %cst_11 {dimension_numbers = #tpu.dot_dimension_numbers<[1], [0], [0], [1], [0, 0, 1, 1], [], []>} : vector<8x32xf32>, vector<32x96xf32>, vector<8x96xf32> -> vector<8x96xf32>
    %c0_12 = arith.constant 0 : index
    %c0_13 = arith.constant 0 : index
    %32 = vector.load %arg4[%c0_12, %c0_13] : memref<1x96xf32, #tpu.memory_space<vmem>>, vector<1x96xf32>
    %33 = vector.broadcast %32 : vector<1x96xf32> to vector<8x96xf32>
    %34 = arith.addf %31, %33 : vector<8x96xf32>
    %35 = vector.extract_strided_slice %34 {offsets = [0, 0], sizes = [8, 32], strides = [1, 1]} : vector<8x96xf32> to vector<8x32xf32>
    %36 = vector.extract_strided_slice %34 {offsets = [0, 32], sizes = [8, 32], strides = [1, 1]} : vector<8x96xf32> to vector<8x32xf32>
    %37 = vector.extract_strided_slice %34 {offsets = [0, 64], sizes = [8, 32], strides = [1, 1]} : vector<8x96xf32> to vector<8x32xf32>
    %38 = vector.extract_strided_slice %35 {offsets = [0, 0], sizes = [8, 8], strides = [1, 1]} : vector<8x32xf32> to vector<8x8xf32>
    %39 = vector.extract_strided_slice %35 {offsets = [0, 8], sizes = [8, 8], strides = [1, 1]} : vector<8x32xf32> to vector<8x8xf32>
    %40 = vector.extract_strided_slice %35 {offsets = [0, 16], sizes = [8, 8], strides = [1, 1]} : vector<8x32xf32> to vector<8x8xf32>
    %41 = vector.extract_strided_slice %35 {offsets = [0, 24], sizes = [8, 8], strides = [1, 1]} : vector<8x32xf32> to vector<8x8xf32>
    %42 = vector.shape_cast %38 : vector<8x8xf32> to vector<1x8x8xf32>
    %43 = vector.shape_cast %39 : vector<8x8xf32> to vector<1x8x8xf32>
    %44 = vector.shape_cast %40 : vector<8x8xf32> to vector<1x8x8xf32>
    %45 = vector.shape_cast %41 : vector<8x8xf32> to vector<1x8x8xf32>
    %46 = tpu.concatenate %42, %43, %44, %45 in 0 : vector<1x8x8xf32>, vector<1x8x8xf32>, vector<1x8x8xf32>, vector<1x8x8xf32> -> vector<4x8x8xf32>
    %47 = vector.extract_strided_slice %36 {offsets = [0, 0], sizes = [8, 8], strides = [1, 1]} : vector<8x32xf32> to vector<8x8xf32>
    %48 = vector.extract_strided_slice %36 {offsets = [0, 8], sizes = [8, 8], strides = [1, 1]} : vector<8x32xf32> to vector<8x8xf32>
    %49 = vector.extract_strided_slice %36 {offsets = [0, 16], sizes = [8, 8], strides = [1, 1]} : vector<8x32xf32> to vector<8x8xf32>
    %50 = vector.extract_strided_slice %36 {offsets = [0, 24], sizes = [8, 8], strides = [1, 1]} : vector<8x32xf32> to vector<8x8xf32>
    %51 = vector.shape_cast %47 : vector<8x8xf32> to vector<1x8x8xf32>
    %52 = vector.shape_cast %48 : vector<8x8xf32> to vector<1x8x8xf32>
    %53 = vector.shape_cast %49 : vector<8x8xf32> to vector<1x8x8xf32>
    %54 = vector.shape_cast %50 : vector<8x8xf32> to vector<1x8x8xf32>
    %55 = tpu.concatenate %51, %52, %53, %54 in 0 : vector<1x8x8xf32>, vector<1x8x8xf32>, vector<1x8x8xf32>, vector<1x8x8xf32> -> vector<4x8x8xf32>
    %56 = vector.extract_strided_slice %37 {offsets = [0, 0], sizes = [8, 8], strides = [1, 1]} : vector<8x32xf32> to vector<8x8xf32>
    %57 = vector.extract_strided_slice %37 {offsets = [0, 8], sizes = [8, 8], strides = [1, 1]} : vector<8x32xf32> to vector<8x8xf32>
    %58 = vector.extract_strided_slice %37 {offsets = [0, 16], sizes = [8, 8], strides = [1, 1]} : vector<8x32xf32> to vector<8x8xf32>
    %59 = vector.extract_strided_slice %37 {offsets = [0, 24], sizes = [8, 8], strides = [1, 1]} : vector<8x32xf32> to vector<8x8xf32>
    %60 = vector.shape_cast %56 : vector<8x8xf32> to vector<1x8x8xf32>
    %61 = vector.shape_cast %57 : vector<8x8xf32> to vector<1x8x8xf32>
    %62 = vector.shape_cast %58 : vector<8x8xf32> to vector<1x8x8xf32>
    %63 = vector.shape_cast %59 : vector<8x8xf32> to vector<1x8x8xf32>
    %64 = tpu.concatenate %60, %61, %62, %63 in 0 : vector<1x8x8xf32>, vector<1x8x8xf32>, vector<1x8x8xf32>, vector<1x8x8xf32> -> vector<4x8x8xf32>
    "tpu.trace_start"() <{level = 10 : i32, message = "hqd,hkd->hqk"}> : () -> ()
    %cst_14 = arith.constant dense<0.000000e+00> : vector<4x8x8xf32>
    %65 = tpu.matmul %46, %55, %cst_14 {dimension_numbers = #tpu.dot_dimension_numbers<[2], [2], [1], [1], [0, 0, 0, 1, 1, 1], [0], [0]>} : vector<4x8x8xf32>, vector<4x8x8xf32>, vector<4x8x8xf32> -> vector<4x8x8xf32>
    "tpu.trace_stop"() : () -> ()
    %cst_15 = arith.constant dense<0xFF800000> : vector<4x8xf32>
    %66 = vector.multi_reduction <maximumf>, %65, %cst_15 [2] : vector<4x8x8xf32> to vector<4x8xf32>
    %67 = vector.shape_cast %66 : vector<4x8xf32> to vector<4x8x1xf32>
    %68 = vector.broadcast %67 : vector<4x8x1xf32> to vector<4x8x8xf32>
    %69 = arith.subf %65, %68 : vector<4x8x8xf32>
    %70 = math.exp %69 : vector<4x8x8xf32>
    %cst_16 = arith.constant dense<0.000000e+00> : vector<4x8xf32>
    %71 = vector.multi_reduction <add>, %70, %cst_16 [2] : vector<4x8x8xf32> to vector<4x8xf32>
    %72 = vector.shape_cast %71 : vector<4x8xf32> to vector<4x8x1xf32>
    "tpu.trace_start"() <{level = 10 : i32, message = "hqk,hkd->hqd"}> : () -> ()
    %cst_17 = arith.constant dense<0.000000e+00> : vector<4x8x8xf32>
    %73 = tpu.matmul %70, %64, %cst_17 {dimension_numbers = #tpu.dot_dimension_numbers<[2], [1], [1], [2], [0, 0, 0, 1, 1, 2], [0], [0]>} : vector<4x8x8xf32>, vector<4x8x8xf32>, vector<4x8x8xf32> -> vector<4x8x8xf32>
    "tpu.trace_stop"() : () -> ()
    %74 = tpu.reciprocal %72 : vector<4x8x1xf32> -> vector<4x8x1xf32>
    %75 = vector.broadcast %74 : vector<4x8x1xf32> to vector<4x8x8xf32>
    %76 = arith.mulf %73, %75 : vector<4x8x8xf32>
    %77 = vector.extract_strided_slice %76 {offsets = [0, 0, 0], sizes = [1, 8, 8], strides = [1, 1, 1]} : vector<4x8x8xf32> to vector<1x8x8xf32>
    %78 = vector.shape_cast %77 : vector<1x8x8xf32> to vector<8x8xf32>
    %79 = vector.extract_strided_slice %76 {offsets = [1, 0, 0], sizes = [1, 8, 8], strides = [1, 1, 1]} : vector<4x8x8xf32> to vector<1x8x8xf32>
    %80 = vector.shape_cast %79 : vector<1x8x8xf32> to vector<8x8xf32>
    %81 = vector.extract_strided_slice %76 {offsets = [2, 0, 0], sizes = [1, 8, 8], strides = [1, 1, 1]} : vector<4x8x8xf32> to vector<1x8x8xf32>
    %82 = vector.shape_cast %81 : vector<1x8x8xf32> to vector<8x8xf32>
    %83 = vector.extract_strided_slice %76 {offsets = [3, 0, 0], sizes = [1, 8, 8], strides = [1, 1, 1]} : vector<4x8x8xf32> to vector<1x8x8xf32>
    %84 = vector.shape_cast %83 : vector<1x8x8xf32> to vector<8x8xf32>
    %85 = tpu.concatenate %78, %80, %82, %84 in 1 : vector<8x8xf32>, vector<8x8xf32>, vector<8x8xf32>, vector<8x8xf32> -> vector<8x32xf32>
    %c0_18 = arith.constant 0 : index
    %c0_19 = arith.constant 0 : index
    %86 = vector.load %arg5[%c0_18, %c0_19] : memref<32x32xf32, #tpu.memory_space<vmem>>, vector<32x32xf32>
    %cst_20 = arith.constant dense<0.000000e+00> : vector<8x32xf32>
    %87 = tpu.matmul %85, %86, %cst_20 {dimension_numbers = #tpu.dot_dimension_numbers<[1], [0], [0], [1], [0, 0, 1, 1], [], []>} : vector<8x32xf32>, vector<32x32xf32>, vector<8x32xf32> -> vector<8x32xf32>
    %c0_21 = arith.constant 0 : index
    %c0_22 = arith.constant 0 : index
    %88 = vector.load %arg6[%c0_21, %c0_22] : memref<1x32xf32, #tpu.memory_space<vmem>>, vector<1x32xf32>
    %89 = vector.broadcast %88 : vector<1x32xf32> to vector<8x32xf32>
    %90 = arith.addf %87, %89 : vector<8x32xf32>
    %c0_23 = arith.constant 0 : index
    %c0_24 = arith.constant 0 : index
    %c0_25 = arith.constant 0 : index
    %91 = vector.load %arg7[%c0_23, %c0_24, %c0_25] : memref<1x8x32xf32, #tpu.memory_space<vmem>>, vector<1x8x32xf32>
    %92 = vector.shape_cast %91 : vector<1x8x32xf32> to vector<8x32xf32>
    %93 = vector.shape_cast %90 : vector<8x32xf32> to vector<1x8x32xf32>
    tpu.vector_store %arg7[%c0_23, %c0_24, %c0_25], %93 {strides = array<i32>} : memref<1x8x32xf32, #tpu.memory_space<vmem>>, vector<1x8x32xf32>,
    return
  }
  func.func @transform_0(%arg0: i32) -> (i32, i32, i32) {
    %c0_i32 = arith.constant 0 : i32
    %c0_i32_0 = arith.constant 0 : i32
    %c0_i32_1 = arith.constant 0 : i32
    return %arg0, %c0_i32, %c0_i32_0 : i32, i32, i32
  }
  func.func @transform_1(%arg0: i32) -> (i32, i32) {
    %c0_i32 = arith.constant 0 : i32
    %c0_i32_0 = arith.constant 0 : i32
    %c0_i32_1 = arith.constant 0 : i32
    return %c0_i32, %c0_i32_0 : i32, i32
  }
  func.func @transform_2(%arg0: i32) -> (i32, i32) {
    %c0_i32 = arith.constant 0 : i32
    %c0_i32_0 = arith.constant 0 : i32
    %c0_i32_1 = arith.constant 0 : i32
    return %c0_i32, %c0_i32_0 : i32, i32
  }
  func.func @transform_3(%arg0: i32) -> (i32, i32) {
    %c0_i32 = arith.constant 0 : i32
    %c0_i32_0 = arith.constant 0 : i32
    %c0_i32_1 = arith.constant 0 : i32
    return %c0_i32, %c0_i32_0 : i32, i32
  }
  func.func @transform_4(%arg0: i32) -> (i32, i32) {
    %c0_i32 = arith.constant 0 : i32
    %c0_i32_0 = arith.constant 0 : i32
    %c0_i32_1 = arith.constant 0 : i32
    return %c0_i32, %c0_i32_0 : i32, i32
  }
  func.func @transform_5(%arg0: i32) -> (i32, i32) {
    %c0_i32 = arith.constant 0 : i32
    %c0_i32_0 = arith.constant 0 : i32
    %c0_i32_1 = arith.constant 0 : i32
    return %c0_i32, %c0_i32_0 : i32, i32
  }
  func.func @transform_6(%arg0: i32) -> (i32, i32, i32) {
    %c0_i32 = arith.constant 0 : i32
    %c0_i32_0 = arith.constant 0 : i32
    %c0_i32_1 = arith.constant 0 : i32
    return %arg0, %c0_i32, %c0_i32_0 : i32, i32, i32
  }
}

</mosaic_0001>

<bundles_post_ra>
// kernel: tpu_custom_call.1
= control target key start
LH: loop header
LB: loop body
LE: loop exit
PB: predicated region body
PF: predicated region fallthrough
CT: control target
= control target key end

     0   :  { %11 = vsyncpa [#allocation3], 0  ;;  %s2022_s0 = inlined_call_operand.hbm [shape: f32[2,8,32], index: 0, kind: input, shape index: {}]   ;;  %s2023_s1 = inlined_call_operand.vmem [shape: f32[2,32], index: 1, kind: input, shape index: {}]   ;;  %s2024_s2 = inlined_call_operand.hbm [shape: f32[32,96], index: 2, kind: input, shape index: {}]   ;;  %s2025_s3 = inlined_call_operand.vmem [shape: f32[1,96], index: 3, kind: input, shape index: {}]   ;;  %s2026_s4 = inlined_call_operand.hbm [shape: f32[32,32], index: 4, kind: input, shape index: {}]   ;;  %s2027_s5 = inlined_call_operand.vmem [shape: f32[1,32], index: 5, kind: input, shape index: {}]   ;;  %s2028_s6 = inlined_call_operand.hbm [shape: f32[2,8,32], index: 6, kind: output, shape index: {}]  }
   0x1   :  { %13 = vsyncpa [#allocation3 + $0x1], 0 }
   0x2   :  { %14 = vsyncpa [#allocation6], 0 }
   0x3   :  { %15 = vsyncpa [#allocation4], 0 }
   0x4   :  { %17 = vsyncpa [#allocation4 + $0x1], 0  ;;  %s1715_s21 = smov 0   ;;  %s1717_s22 = smov 0  }
   0x5   :  { %s1719_s23 = smov 0   ;;  %s1721_s24 = smov 0  }
   0x6 LB: > { %s1736_s25 = sadd.s32 4294967295, %s1661_s24   ;;  %s1273_s26 = sadd.s32 4294967294, %s1661_s24   ;;  %s1661_s24 = sphi %s1721_s24, %s2048_s24   ;;  %s1657_s23 = sphi %s1719_s23, %s2047_s23   ;;  %s1653_s22 = sphi %s1717_s22, %s2046_s22   ;;  %s1649_s21 = sphi %s1715_s21, %s2045_s21  }
   0x7   : > { %p43_p0 = scmp.ne.s32.totalorder %s1653_s22, %s1649_s21  ;;  %p2029_p1 = scmp.eq.s32.totalorder %s1736_s25, 0 }
   0x8   : > { %p178_p3 = scmp.eq.s32.totalorder %s1273_s26, 1  ;;  %p1274_p5 = scmp.ge.s32.totalorder %s1661_s24, 1 }
   0x9   : > { %p1745_p4 = por %p2029_p1, %p43_p0  ;;  %p185_p7 = scmp.lt.s32.totalorder %s1661_s24, 3 }
   0xa   : > { %p1750_p6 = por %p178_p3, %p43_p0  ;;  %s1663_s30 = smov [#allocation5]  }
   0xb   : > { %s2032_s27 = scalar_select %p1745_p4, 1, 0 }
   0xc   : > { %s2033_s28 = scalar_select %p1750_p6, 1, 0 }
   0xd   : > { %p1755_p8 = pnand %p1274_p5, %p185_p7  ;;  %s200_s7 = sshll.u32 %s1663_s30, 4  ;;  %s1759_s7 = int_to_ptr.vmem [resolvable:$true] %s200_s7 }
   0xe   : > { %s1664_s9 = smov [#allocation7]   ;;  %s1505_s13 = scalar_lea.hbm %s2024_s2, 512 }
   0xf   : > { %p1419_p9 = pneg %p1755_p8  ;;  %s216_s10 = sshll.u32 %s1664_s9, 4  ;;  %s1770_s10 = int_to_ptr.vmem [resolvable:$true] %s216_s10 }
  0x10   : > { %p1506_p12 = scmp.ne.s32.totalorder %s2024_s2, %s1505_s13  ;;  %p1512_p5 = scmp.lt.u32.totalorder %s1505_s13, %s2024_s2 }
  0x11   : > { %p1766_p11 = pnand %p1419_p9, %p2029_p1 }
  0x13   : > { %p1507_p13 = pneg %p1766_p11 }
  0x15   : > { %p1508_p0 = pnand %p1507_p13, %p1506_p12 }
  0x17   : > { %p1509_p3 = pneg %p1508_p0 }
  0x19   : > { %p1514_p7 = pnand %p1512_p5, %p1509_p3 }
  0x1b   : > { %1517 = shalt.err (!%p1514_p7)
}
  0x1c   : > { %s1518_s18 = scalar_lea.vmem %s1759_s7, 512  ;;  %p1526_p2 = scmp.lt.s32.totalorder %s1759_s7, %s1759_s7 }
  0x1d   : > { %p1519_p9 = scmp.ne.s32.totalorder %s1759_s7, %s1518_s18  ;;  %p1527_p12 = scmp.lt.s32.totalorder %s1518_s18, %s1518_s18 }
  0x1f   : > { %p1521_p10 = pnand %p1519_p9, %p1507_p13  ;;  %p1528_p0 = por %p1527_p12, %p1526_p2 }
  0x21   : > { %p1522_p1 = pneg %p1521_p10 }
  0x23   : > { %p1529_p6 = pnand %p1528_p0, %p1522_p1 }
  0x25   : > { %1532 = shalt.err (!%p1529_p6)
}
  0x26   : > { %s1665_s19 = smov 128   ;;  %s1666_s20 = smov 8  }
  0x27   : > { %1422 = dma.hbm_to_vmem [thread:$0]  (!%p1766_p11), %s2024_s2, 512, %s1759_s7, [#allocation6], %s1665_s19, %s1665_s19, %s1666_s20  }
  0x28   : > { %s1533_s12 = scalar_lea.hbm %s2026_s4, 512 }
  0x29   : > { %p1534_p2 = scmp.ne.s32.totalorder %s2026_s4, %s1533_s12  ;;  %p1540_p10 = scmp.lt.u32.totalorder %s1533_s12, %s2026_s4 }
  0x2b   : > { %p1536_p1 = pnand %p1534_p2, %p1507_p13 }
  0x2d   : > { %p1537_p6 = pneg %p1536_p1 }
  0x2f   : > { %p1542_p3 = pnand %p1540_p10, %p1537_p6 }
  0x31   : > { %1545 = shalt.err (!%p1542_p3)
}
  0x32   : > { %s1546_s7 = scalar_lea.vmem %s1770_s10, 512  ;;  %p1554_p12 = scmp.lt.s32.totalorder %s1770_s10, %s1770_s10 }
  0x33   : > { %p1547_p5 = scmp.ne.s32.totalorder %s1770_s10, %s1546_s7  ;;  %p1555_p0 = scmp.lt.s32.totalorder %s1546_s7, %s1546_s7 }
  0x35   : > { %p1549_p7 = pnand %p1547_p5, %p1507_p13  ;;  %p1556_p2 = por %p1555_p0, %p1554_p12 }
  0x37   : > { %p1550_p9 = pneg %p1549_p7 }
  0x39   : > { %p1557_p1 = pnand %p1556_p2, %p1550_p9 }
  0x3b   : > { %1560 = shalt.err (!%p1557_p1)
}
  0x3c   : > { %1425 = dma.hbm_to_vmem [thread:$0]  (!%p1766_p11), %s2026_s4, 512, %s1770_s10, [#allocation6], %s1665_s19, %s1665_s19, %s1666_s20  }
  0x3d   : > { %s1825_s26 = sadd.s32 1, %s1661_s24   ;;  %s30_s8 = sadd.s32 1, %s1657_s23 }
  0x3e   : > { %s27_s30 = ssub.s32 %s1661_s24, %s1825_s26  ;;  %p37_p13 = scmp.ne.s32.totalorder %s1657_s23, %s1653_s22 }
  0x3f   : > { %p28_p6 = scmp.eq.s32.totalorder %s27_s30, 0  ;;  %p38_p10 = scmp.eq.s32.totalorder %s1661_s24, 0 }
  0x40   : > { %p2036_p3 = scmp.eq.s32.totalorder %s1736_s25, 1  ;;  %p1436_p7 = scmp.lt.s32.totalorder %s1661_s24, 2 }
  0x41   : > { %s1841_s11 = scalar_select %p28_p6, %s1657_s23, %s30_s8  }
  0x42   : > { %p1835_p5 = por %p2036_p3, %p37_p13  ;;  %p39_p9 = por %p38_p10, %p37_p13 }
  0x43   : > { %s233_s12 = sand.u32 1, %s1657_s23   ;;  %s1279_s10 = sshll.u32 %s1661_s24, 7 }
  0x44   : > { %s2037_s9 = scalar_select %p1835_p5, 1, 0 }
  0x45   : > { %s1278_s13 = sshll.u32 %s233_s12, 3  ;;  %s1848_s14 = scalar_lea.hbm %s2022_s0, %s1279_s10 }
  0x46   : > { %s237_s15 = scalar_lea.vmem [#allocation2], %s1278_s13  ;;  %p1852_p11 = pnand %p1436_p7, %p39_p9 }
  0x47   : > { %s244_s16 = sshll.u32 %s237_s15, 4  ;;  %s234_s17 = scalar_lea.sflag [#allocation3], %s233_s12  ;;  %s1850_s16 = int_to_ptr.vmem [resolvable:$true] %s244_s16 }
  0x48   : > { %s1561_s18 = scalar_lea.hbm %s1848_s14, 128  ;;  %p1563_p0 = pneg %p1852_p11 }
  0x49   : > { %p1562_p12 = scmp.ne.s32.totalorder %s1848_s14, %s1561_s18  ;;  %s1566_s13 = scalar_lea.hbm %s2022_s0, 256 }
  0x4a   : > { %p1567_p13 = scmp.lt.u32.totalorder %s1848_s14, %s2022_s0  ;;  %p1568_p6 = scmp.lt.u32.totalorder %s1566_s13, %s1561_s18 }
  0x4b   : > { %p1564_p2 = pnand %p1563_p0, %p1562_p12  ;;  %p1570_p3 = scmp.lt.u32.totalorder %s1561_s18, %s1848_s14 }
  0x4c   : > { %p1569_p10 = por %p1568_p6, %p1567_p13 }
  0x4d   : > { %p1565_p1 = pneg %p1564_p2 }
  0x4e   : > { %p1571_p7 = por %p1570_p3, %p1569_p10 }
  0x50   : > { %p1572_p9 = pnand %p1571_p7, %p1565_p1 }
  0x52   : > { %1575 = shalt.err (!%p1572_p9)
}
  0x53   : > { %s1576_s12 = scalar_lea.vmem %s1850_s16, 128  ;;  %s1667_s20 = smov [#allocation2]  }
  0x54   : > { %p1577_p12 = scmp.ne.s32.totalorder %s1850_s16, %s1576_s12  ;;  %s1581_s15 = sshll.u32 %s1667_s20, 4  ;;  %s1582_s15 = int_to_ptr.vmem [resolvable:$false] %s1581_s15 }
  0x55   : > { %s1583_s8 = scalar_lea.vmem %s1582_s15, 256  ;;  %p1584_p4 = scmp.lt.s32.totalorder %s1850_s16, %s1582_s15 }
  0x56   : > { %p1579_p2 = pnand %p1577_p12, %p1563_p0  ;;  %p1585_p13 = scmp.lt.s32.totalorder %s1583_s8, %s1576_s12 }
  0x58   : > { %p1580_p5 = pneg %p1579_p2  ;;  %p1586_p6 = por %p1585_p13, %p1584_p4 }
  0x5a   : > { %p1587_p10 = pnand %p1586_p6, %p1580_p5 }
  0x5c   : > { %1590 = shalt.err (!%p1587_p10)
}
  0x5d   : > { %1429 = dma.hbm_to_vmem [thread:$0]  (!%p1852_p11), %s1848_s14, 128, %s1850_s16, %s234_s17  }
  0x5e   : > { %253 = sbr.rel (%p1755_p8) target bundleno = 1802 (0x70a), region = 44  ;;  %s1884_s18 = sand.u32 (!%p1755_p8), 1, %s1653_s22  }
  0x5f   : > { %s1281_s30 = sshll.u32 (!%p1755_p8), %s1884_s18, 3  ;;  %s256_s13 = scalar_lea.sflag (!%p1755_p8), [#allocation3], %s1884_s18 }
  0x60   : > { %s259_s10 = scalar_lea.vmem (!%p1755_p8), [#allocation2], %s1281_s30  ;;  %p2039_p4 = scmp.ne.s32.totalorder (!%p1755_p8), %s2032_s27, 0 }
  0x65   : > { %1636 = dma.done.wait (%p2039_p4), %s256_s13, 128  }
  0x66   : > { %1638 = vsyncadd (%p2039_p4), %s256_s13, 4294967168  ;;  %p2040_p5 = scmp.eq.s32.totalorder %s1736_s25, 0 }
  0x68   : > { %1640 = dma.done.wait (%p2040_p5), [#allocation6], 1024   ;;  %p2041_p8 = pmov %p2040_p5 }
  0x69   : > { %vm297_vm0 = vcmask 261120   ;;  %v296_v0 = vld [vmem:[%s259_s10] sm:$0xff]  ;;  %v324_v7 = vld [vmem:[#allocation5] sm:$0xff]  ;;  %v325_v8 = vld [vmem:[#allocation5 + $0x8] sm:$0xff]  ;;  %v1668_v10 = vmov 0.0|0.0   ;;  %vm1669_vm1 = vmmov 0  }
  0x6a   : > { %1642 = vsyncadd (%p2041_p8), [#allocation6], 4294966272  ;;  %v298_v1 = vsel %vm297_vm0, %v296_v0, 0.0  ;;  %v326_v9 = vld [vmem:[#allocation5 + $0x10] sm:$0xff]  ;;  %1395 = vmatprep.subr.bf16.mxu0 %v1668_v10  ;;  %v1396_v11 = vpack.c.bf16 %v325_v8, %v324_v7  ;;  %v327_v12 = vld [vmem:[#allocation5 + $0x18] sm:$0xff]  ;;  %v1670_v13 = vmov 0.0  }
  0x6b   : > { %299 = vadd.xlane.f32.xlu0 %v298_v1  ;;  %1341 = vmatprep.mubr.msk.f32.mxu0 %vm1669_vm1, %v1670_v13  ;;  %v1399_v14 = vpack.c.bf16 %v327_v12, %v326_v9  ;;  %v1285_v19 = vld [vmem:[%s2023_s1] ss:$0 sm:$0xff]  ;;  %v1286_v21 = vld [vmem:[%s2023_s1 + $0x1] ss:$0 sm:$0xff]  ;;  %s1671_s19 = smov 104   ;;  %s1672_s12 = smov 120  }
  0x6c   : > { %1344 = vmatprep.subr.mxu1 %v1670_v13  ;;  %1346 = vmatprep.mubr.msk.f32.mxu1 %vm1669_vm1, %v1670_v13  ;;  %v1287_v24 = vld [vmem:[%s2025_s3] ss:$0 sm:$0xff]  ;;  %s1673_s20 = smov 112   ;;  %s1674_s15 = smov 96   ;;  %vm417_vm2 = vcmask 64512   ;;  %v1086_v12 = vld [vmem:[#allocation7 + $0x8] sm:$0xff] }
  0x6d   : > { %1397 = vmatpush3.bf16.msra.mxu0 %v1396_v11  ;;  %s1675_s8 = smov 64   ;;  %v1085_v11 = vld [vmem:[#allocation7] sm:$0xff]  ;;  %s1676_s13 = smov 8   ;;  %vm1081_vm3 = vcmask 130048   ;;  %vm1083_vm4 = vcmask 195584  }
  0x6e   : > { %1398 = vmatprep.subr.bf16.mxu0 %v1668_v10  ;;  %s1677_s10 = smov 16   ;;  %s1678_s27 = smov 24  }
  0x6f   : > { %s1304_s16 = sshll.u32 %s1736_s25, 7  ;;  %s295_s7 = scalar_lea.vmem [#allocation8], %s1281_s30 }
  0x70   : > { %s1184_s17 = sshll.u32 %s295_s7, 4  ;;  %p2042_p0 = scmp.ne.s32.totalorder %s2037_s9, 0  ;;  %s1979_s17 = int_to_ptr.vmem [resolvable:$true] %s1184_s17 }
  0x71   : > { %1400 = vmatpush3.bf16.msra.mxu0 %v1399_v14  ;;  %s1591_s25 = scalar_lea.vmem %s1979_s17, 128  ;;  %s1679_s30 = smov [#allocation8]  }
  0x72   : > { %1364 = vmatprep.subr.mxu0 %v1670_v13  ;;  %p1592_p11 = scmp.ne.s32.totalorder %s1979_s17, %s1591_s25 }
  0x74   : > { %p1593_p1 = pnand %p1592_p11, %p2042_p0 }
  0x76   : > { %p1594_p3 = pneg %p1593_p1 }
  0xf8   : > { %v300_v2 = vpop.xlane.xlu0 %299 }
  0xf9   : > { %v302_v3 = vmul.f32 0.03125, %v300_v2 }
  0xfb   : > { %v303_v4 = vsub.f32 %v296_v0, %v302_v3 }
  0xfd   : > { %v304_v5 = vmul.f32 %v303_v4, %v303_v4 }
  0xff   : > { %v305_v6 = vsel %vm297_vm0, %v304_v5, 0.0 }
 0x100   : > { %306 = vadd.xlane.f32.xlu0 %v305_v6 }
 0x18d   : > { %v307_v15 = vpop.xlane.xlu0 %306 }
 0x18e   : > { %v308_v16 = vmul.f32 0.03125, %v307_v15  ;;  %v1402_v15 = vpack.c.bf16 %v1086_v12, %v1085_v11 }
 0x190   : > { %v309_v17 = vadd.f32 1e-05, %v308_v16  ;;  %v1088_v16 = vld [vmem:[#allocation7 + $0x18] sm:$0xff] }
 0x192   : > { %1487 = vrsqrt.f32 %v309_v17 }
 0x19c   : > { %v1488_v18 = vpop.eup %1487 }
 0x19d   : > { %v311_v20 = vmul.f32 %v1488_v18, %v303_v4 }
 0x19f   : > { %v317_v22 = vmul.f32 %v1285_v19, %v311_v20 }
 0x1a1   : > { %v323_v23 = vadd.f32 %v1286_v21, %v317_v22 }
 0x1a3   : > { %1342 = vmatmul.mubr.msk.f32.vlgmr.msra.gmra.mrb[0].mxu0 %vm297_vm0, %v323_v23 }
 0x1a4   : > { %1366 = vmatprep.mubr.msk.f32.mxu0 %vm1669_vm1, %v1670_v13 }
 0x276   : > { %v404_v25 = vpop.f32.mrb[0].mxu0 }
 0x277   : > { %v405_v26 = vadd.f32 %v1287_v24, %v404_v25  ;;  %v1343_v27 = vpop.f32.mrb[1].mxu0 }
 0x279   : > { %413 = vrot.lane.b32.xlu0 %v405_v26, %s1671_s19  ;;  %409 = vrot.lane.b32.xlu1 %v405_v26, %s1672_s12 }
 0x27d   : > { %411 = vrot.lane.b32.xlu1 %v405_v26, %s1673_s20  ;;  %s1977_s20 = scalar_lea.hbm %s2028_s6, %s1304_s16 }
 0x281   : > { %415 = vrot.lane.b32.xlu1 %v405_v26, %s1674_s15 }
 0x2eb   : > { %v410_v28 = vpop.permute.xlu1 %409  ;;  %v414_v30 = vpop.permute.xlu0 %413 }
 0x2ec   : > { %492 = vrot.lane.b32.xlu1 %v410_v28, %s1674_s15 }
 0x2ef   : > { %v412_v29 = vpop.permute.xlu1 %411 }
 0x2f0   : > { %568 = vrot.lane.b32.xlu1 %v412_v29, %s1674_s15 }
 0x2f3   : > { %v416_v31 = vpop.permute.xlu1 %415 }
 0x2f4   : > { %644 = vrot.lane.b32.xlu1 %v414_v30, %s1674_s15  ;;  %1345 = vmatpush3.xpose.msk.msra.mxu1 %vm417_vm2, %v416_v31  ;;  %s1171_s15 = scalar_lea.sflag [#allocation4], %s1884_s18 }
 0x2f5   : > { %1349 = vmatprep.subr.mxu1 %v1670_v13 }
 0x2f7   : > { %1347 = vmatmul.mubr.msk.f32.vlgmr.msra.gmra.mrb[0].mxu1 %vm417_vm2, %v405_v26 }
 0x2f8   : > { %756 = vrot.lane.b32.xlu1 %v405_v26, %s1675_s8  ;;  %1351 = vmatprep.mubr.msk.f32.mxu1 %vm1669_vm1, %v1670_v13 }
 0x35e   : > { %v493_v32 = vpop.permute.xlu1 %492 }
 0x35f   : > { %1350 = vmatpush3.xpose.msk.msra.mxu1 %vm417_vm2, %v493_v32 }
 0x360   : > { %1354 = vmatprep.subr.mxu1 %v1670_v13 }
 0x362   : > { %1352 = vmatmul.mubr.msk.f32.vlgmr.msra.gmra.mrb[2].mxu1 %vm417_vm2, %v410_v28  ;;  %v569_v33 = vpop.permute.xlu1 %568 }
 0x363   : > { %1355 = vmatpush3.xpose.msk.msra.mxu1 %vm417_vm2, %v569_v33  ;;  %1356 = vmatprep.mubr.msk.f32.mxu1 %vm1669_vm1, %v1670_v13 }
 0x364   : > { %1359 = vmatprep.subr.mxu1 %v1670_v13 }
 0x366   : > { %1357 = vmatmul.mubr.msk.f32.vlgmr.msra.gmra.mrb[4].mxu1 %vm417_vm2, %v412_v29  ;;  %v645_v34 = vpop.permute.xlu1 %644 }
 0x367   : > { %1360 = vmatpush3.xpose.msk.msra.mxu1 %vm417_vm2, %v645_v34  ;;  %1361 = vmatprep.mubr.msk.f32.mxu1 %vm1669_vm1, %v1670_v13 }
 0x368   : > { %1369 = vmatprep.subr.mxu1 %v1670_v13 }
 0x36a   : > { %1362 = vmatmul.mubr.msk.f32.vlgmr.msra.gmra.mrb[6].mxu1 %vm417_vm2, %v414_v30  ;;  %v757_v35 = vpop.permute.xlu1 %756 }
 0x36b   : > { %1365 = vmatpush3.msra.mxu0 %v757_v35  ;;  %1371 = vmatprep.mubr.msk.f32.mxu1 %vm1669_vm1, %v1670_v13 }
 0x36c   : > { %1374 = vmatprep.subr.mxu0 %v1670_v13 }
 0x3ca   : > { %v488_v36 = vpop.f32.mrb[0].mxu1 }
 0x3cb   : > { %v1348_v37 = vpop.f32.mrb[1].mxu1  ;;  %v720_v38 = vsel %vm417_vm2, %v488_v36, -inf }
 0x3cc   : > { %721 = vmax.xlane.f32.xlu1 %v720_v38 }
 0x435   : > { %v564_v39 = vpop.f32.mrb[2].mxu1 }
 0x436   : > { %v1353_v40 = vpop.f32.mrb[3].mxu1  ;;  %v723_v41 = vsel %vm417_vm2, %v564_v39, -inf }
 0x437   : > { %724 = vmax.xlane.f32.xlu0 %v723_v41 }
 0x439   : > { %v640_v42 = vpop.f32.mrb[4].mxu1 }
 0x43a   : > { %v1358_v43 = vpop.f32.mrb[5].mxu1  ;;  %v726_v44 = vsel %vm417_vm2, %v640_v42, -inf }
 0x43b   : > { %727 = vmax.xlane.f32.xlu1 %v726_v44 }
 0x43d   : > { %v716_v45 = vpop.f32.mrb[6].mxu1 }
 0x43e   : > { %v1363_v46 = vpop.f32.mrb[7].mxu1  ;;  %v729_v47 = vsel %vm417_vm2, %v716_v45, -inf }
 0x43f   : > { %730 = vmax.xlane.f32.xlu0 %v729_v47 }
 0x44c   : > { %908 = vrot.lane.b32.xlu1 %v412_v29, %s1675_s8 }
 0x450   : > { %984 = vrot.lane.b32.xlu1 %v414_v30, %s1675_s8 }
 0x455   : > { %832 = vrot.lane.b32.xlu0 %v410_v28, %s1675_s8  ;;  %s1595_s8 = sshll.u32 %s1679_s30, 4  ;;  %s1596_s8 = int_to_ptr.vmem [resolvable:$false] %s1595_s8 }
 0x456   : > { %p1598_p7 = scmp.lt.s32.totalorder %s1979_s17, %s1596_s8 }
 0x459   : > { %v722_v48 = vpop.xlane.xlu1 %721 }
 0x45a   : > { %v732_v49 = vsub.f32 %v488_v36, %v722_v48 }
 0x45c   : > { %v736_v50 = vmul.f32 1.442695, %v732_v49 }
 0x45e   : > { %1489 = vpow2.f32 %v736_v50 }
 0x468   : > { %v1490_v51 = vpop.eup %1489 }
 0x469   : > { %1367 = vmatmul.mubr.msk.f32.vlgmr.msra.gmra.mrb[2].mxu0 %vm417_vm2, %v1490_v51  ;;  %v744_v6 = vsel %vm417_vm2, %v1490_v51, 0.0 }
 0x46a   : > { %1376 = vmatprep.mubr.msk.f32.mxu0 %vm1669_vm1, %v1670_v13 }
 0x4c4   : > { %v725_v52 = vpop.xlane.xlu0 %724 }
 0x4c5   : > { %v733_v53 = vsub.f32 %v564_v39, %v725_v52  ;;  %v1301_v39 = vld [vmem:[%s2027_s5] ss:$0 sm:$0xff] }
 0x4c7   : > { %v738_v54 = vmul.f32 1.442695, %v733_v53 }
 0x4c8   : > { %v728_v55 = vpop.xlane.xlu1 %727 }
 0x4c9   : > { %1491 = vpow2.f32 %v738_v54  ;;  %v734_v56 = vsub.f32 %v640_v42, %v728_v55 }
 0x4cb   : > { %v740_v57 = vmul.f32 1.442695, %v734_v56 }
 0x4cc   : > { %v731_v58 = vpop.xlane.xlu0 %730  ;;  %v909_v59 = vpop.permute.xlu1 %908 }
 0x4cd   : > { %1493 = vpow2.f32 %v740_v57  ;;  %v735_v60 = vsub.f32 %v716_v45, %v731_v58  ;;  %1375 = vmatpush3.msra.mxu0 %v909_v59 }
 0x4ce   : > { %1401 = vmatprep.subr.bf16.mxu0 %v1668_v10 }
 0x4cf   : > { %v742_v61 = vmul.f32 1.442695, %v735_v60 }
 0x4d0   : > { %v833_v62 = vpop.permute.xlu0 %832  ;;  %v985_v0 = vpop.permute.xlu1 %984 }
 0x4d1   : > { %1495 = vpow2.f32 %v742_v61  ;;  %1370 = vmatpush3.msra.mxu1 %v833_v62 }
 0x4d2   : > { %1379 = vmatprep.subr.mxu1 %v1670_v13 }
 0x4d3   : > { %v1492_v63 = vpop.eup %1491 }
 0x4d4   : > { %1372 = vmatmul.mubr.msk.f32.vlgmr.msra.gmra.mrb[8].mxu1 %vm417_vm2, %v1492_v63  ;;  %v747_v1 = vsel %vm417_vm2, %v1492_v63, 0.0 }
 0x4d5   : > { %1380 = vmatpush3.msra.mxu1 %v985_v0  ;;  %748 = vadd.xlane.f32.xlu0 %v747_v1 }
 0x4d6   : > { %1381 = vmatprep.mubr.msk.f32.mxu1 %vm1669_vm1, %v1670_v13 }
 0x4d7   : > { %v1494_v2 = vpop.eup %1493 }
 0x4d8   : > { %1377 = vmatmul.mubr.msk.f32.vlgmr.msra.gmra.mrb[4].mxu0 %vm417_vm2, %v1494_v2  ;;  %v750_v3 = vsel %vm417_vm2, %v1494_v2, 0.0 }
 0x4d9   : > { %751 = vadd.xlane.f32.xlu1 %v750_v3  ;;  %1392 = vmatprep.mubr.msk.f32.mxu0 %vm1669_vm1, %v1670_v13  ;;  %v1087_v13 = vld [vmem:[#allocation7 + $0x10] sm:$0xff] }
 0x4da   : > { %1403 = vmatpush3.bf16.msra.mxu0 %v1402_v15  ;;  %v1405_v18 = vpack.c.bf16 %v1088_v16, %v1087_v13 }
 0x4db   : > { %v1496_v4 = vpop.eup %1495  ;;  %1404 = vmatprep.subr.bf16.mxu0 %v1668_v10 }
 0x4dc   : > { %1382 = vmatmul.mubr.msk.f32.vlgmr.msra.gmra.mrb[10].mxu1 %vm417_vm2, %v1496_v4  ;;  %v753_v5 = vsel %vm417_vm2, %v1496_v4, 0.0 }
 0x4dd   : > { %754 = vadd.xlane.f32.xlu0 %v753_v5 }
 0x4de   : > { %1406 = vmatpush3.bf16.msra.mxu0 %v1405_v18 }
 0x4e1   : > { %745 = vadd.xlane.f32.xlu0 %v744_v6 }
 0x53c   : > { %v828_v7 = vpop.f32.mrb[2].mxu0 }
 0x53d   : > { %v1368_v8 = vpop.f32.mrb[3].mxu0 }
 0x562   : > { %v749_v9 = vpop.xlane.xlu0 %748 }
 0x563   : > { %1497 = vrcp.f32 %v749_v9 }
 0x566   : > { %v752_v14 = vpop.xlane.xlu1 %751 }
 0x567   : > { %1499 = vrcp.f32 %v752_v14 }
 0x56a   : > { %v755_v17 = vpop.xlane.xlu0 %754 }
 0x56b   : > { %1501 = vrcp.f32 %v755_v17 }
 0x56d   : > { %v1498_v19 = vpop.eup %1497 }
 0x56e   : > { %v746_v30 = vpop.xlane.xlu0 %745 }
 0x56f   : > { %1503 = vrcp.f32 %v746_v30 }
 0x571   : > { %v1500_v23 = vpop.eup %1499 }
 0x575   : > { %v1502_v27 = vpop.eup %1501 }
 0x579   : > { %v1504_v31 = vpop.eup %1503 }
 0x57a   : > { %v1064_v33 = vmul.f32 %v1504_v31, %v828_v7 }
 0x5a7   : > { %v904_v20 = vpop.f32.mrb[8].mxu1 }
 0x5a8   : > { %v1065_v21 = vmul.f32 %v1498_v19, %v904_v20  ;;  %v1373_v22 = vpop.f32.mrb[9].mxu1 }
 0x5aa   : > { %1069 = vrot.lane.b32.xlu1 %v1065_v21, %s1676_s13  ;;  %s1597_s13 = scalar_lea.vmem %s1596_s8, 256 }
 0x5ab   : > { %v980_v24 = vpop.f32.mrb[4].mxu0  ;;  %p1599_p9 = scmp.lt.s32.totalorder %s1597_s13, %s1591_s25 }
 0x5ac   : > { %v1066_v25 = vmul.f32 %v1500_v23, %v980_v24  ;;  %v1378_v26 = vpop.f32.mrb[5].mxu0 }
 0x5ad   : > { %p1600_p12 = por %p1599_p9, %p1598_p7 }
 0x5ae   : > { %1073 = vrot.lane.b32.xlu0 %v1066_v25, %s1677_s10 }
 0x5af   : > { %v1056_v10 = vpop.f32.mrb[10].mxu1  ;;  %p1601_p2 = pnand %p1600_p12, %p1594_p3 }
 0x5b0   : > { %v1067_v28 = vmul.f32 %v1502_v27, %v1056_v10  ;;  %v1383_v29 = vpop.f32.mrb[11].mxu1 }
 0x5b2   : > { %1077 = vrot.lane.b32.xlu1 %v1067_v28, %s1678_s27 }
 0x61c   : > { %v1070_v32 = vpop.permute.xlu1 %1069 }
 0x61d   : > { %v1080_v35 = vsel %vm417_vm2, %v1064_v33, %v1070_v32 }
 0x620   : > { %v1074_v34 = vpop.permute.xlu0 %1073 }
 0x621   : > { %v1082_v36 = vsel %vm1081_vm3, %v1080_v35, %v1074_v34 }
 0x624   : > { %v1078_v37 = vpop.permute.xlu1 %1077 }
 0x625   : > { %v1084_v38 = vsel %vm1083_vm4, %v1082_v36, %v1078_v37 }
 0x626   : > { %1393 = vmatmul.mubr.msk.f32.vlgmr.msra.gmra.mrb[6].mxu0 %vm297_vm0, %v1084_v38 }
 0x6f9   : > { %v1165_v40 = vpop.f32.mrb[6].mxu0 }
 0x6fa   : > { %v1166_v41 = vadd.f32 %v1301_v39, %v1165_v40  ;;  %v1394_v42 = vpop.f32.mrb[7].mxu0 }
 0x6fc   : > { %1169 = vst.msk [vmem:[%s295_s7] sm:$0xff] %vm297_vm0, %v1166_v41 }
 0x6fd   : > { %1604 = shalt.err (!%p1601_p2)
}
 0x6fe   : > { %s1605_s18 = scalar_lea.hbm %s1977_s20, 128  ;;  %s1609_s29 = scalar_lea.hbm %s2028_s6, 256 }
 0x6ff   : > { %p1606_p13 = scmp.ne.s32.totalorder %s1977_s20, %s1605_s18  ;;  %p1610_p4 = scmp.lt.u32.totalorder %s1977_s20, %s2028_s6 }
 0x700   : > { %p1611_p5 = scmp.lt.u32.totalorder %s1609_s29, %s1605_s18  ;;  %p1613_p11 = scmp.lt.u32.totalorder %s1605_s18, %s1977_s20 }
 0x701   : > { %p1607_p6 = pnand %p1606_p13, %p2042_p0 }
 0x702   : > { %p1612_p8 = por %p1611_p5, %p1610_p4 }
 0x703   : > { %p1608_p10 = pneg %p1607_p6 }
 0x704   : > { %p1614_p1 = por %p1613_p11, %p1612_p8 }
 0x706   : > { %p1615_p3 = pnand %p1614_p1, %p1608_p10 }
 0x708   : > { %1618 = shalt.err (!%p1615_p3)
}
 0x709   : > { %1417 = dma.vmem_to_hbm [thread:$0]  (%p2042_p0), %s1979_s17, 128, %s1977_s20, %s1171_s15  }
 0x70a PF: > { %s1196_s7 = sand.u32 1, %s1649_s21   ;;  %p2043_p7 = scmp.ne.s32.totalorder %s2033_s28, 0 }
 0x70b   : > { %p2044_p9 = scmp.ge.s32.totalorder %s1661_s24, 2  ;;  %s1197_s19 = scalar_lea.sflag [#allocation4], %s1196_s7 }
 0x70d   : > { %p1431_p12 = pnand %p2044_p9, %p2043_p7 }
 0x70f   : > { %1644 = dma.done.wait (!%p1431_p12), %s1197_s19, 128  }
 0x710   : > { %1646 = vsyncadd (!%p1431_p12), %s1197_s19, 4294967168  ;;  %p20_p2 = scmp.ge.s32.totalorder %s1825_s26, 4   ;;  %s2045_s21 = smov %s1653_s22 }
 0x711   : > { %s2046_s22 = smov %s1657_s23  ;;  %s2047_s23 = smov %s1841_s11 }
 0x712   : > { %s2048_s24 = smov %s1825_s26  ;;  %22 = sbr.rel (!%p20_p2) target bundleno = 6 (0x6), region = 97 }
 0x719   :  { %1202 = vsyncpa [#allocation3], 1 }
 0x71a   :  { %1204 = vsyncpa [#allocation3 + $0x1], 1 }
 0x71b   :  { %1205 = vsyncpa [#allocation6], 1 }
 0x71c   :  { %1206 = vsyncpa [#allocation4], 1 }
 0x71d   :  { %1208 = vsyncpa [#allocation4 + $0x1], 1 }

</bundles_post_ra>
